<compile_context>
chip_gen: v7x
topology: tpu7x:2x2x1
jax: 0.10.0
libtpu: 0.0.40
codegen_flags: <defaults>
</compile_context>

<pallas_src>
import jax
import jax.numpy as jnp
from jax.experimental import pallas as pl
from jax.experimental.pallas import tpu as pltpu


def _round_up(x, m):
    return ((x + m - 1) // m) * m


def _pick_tile_b(b_pad128, tile_b_request):
    """Largest 128-multiple tile <= tile_b_request that evenly divides b_pad128.

    Keeps n_tiles >= 2 when possible so v7x's two TensorCores both get work
    (the batch grid axis is marked "parallel" and is sharded across TCs).
    """
    m = b_pad128 // 128
    cap = max(tile_b_request // 128, 1)
    best = 1
    for d in range(1, m + 1):          # trace-time only; m is small
        if m % d == 0 and d <= cap:
            best = d
    if best == m and m >= 2:           # would be a single grid step -> split
        for d in range(m - 1, 0, -1):
            if m % d == 0:
                best = d
                break
    return 128 * best


def value_net_kernel(x_ref, w1_ref, b1_ref, w2_ref, b2_ref, w3_ref, b3_ref, o_ref):
    # One (TILE_B, num_inputs) slab of states per grid step; weights/biases are
    # pinned to block (0, 0), single-buffered, and stay VMEM-resident.
    mm_dtype = w1_ref.dtype            # f32 by default; bf16 if params are bf16

    x = x_ref[...].astype(mm_dtype)    # cast after the DMA (no extra HBM pass)
    h1 = jnp.dot(x, w1_ref[...], preferred_element_type=jnp.float32)
    h1 = jnp.maximum(h1 + b1_ref[...].astype(jnp.float32), 0.0)   # f32 bias+ReLU

    h2 = jnp.dot(h1.astype(mm_dtype), w2_ref[...],
                 preferred_element_type=jnp.float32)
    h2 = jnp.maximum(h2 + b2_ref[...].astype(jnp.float32), 0.0)

    # Final Linear(hidden -> 1) on the VPU/XLU: elementwise multiply by the
    # (1, hidden) weight row, reduce over the lane axis, and store the
    # sublane-major (TILE_B, 1) column directly (no sublane->lane transpose;
    # the output stream is ~1/16th of the state stream, so this is cheap).
    v = jnp.sum(h2 * w3_ref[...].astype(jnp.float32), axis=-1, keepdims=True)
    o_ref[...] = (v + b3_ref[0]).astype(o_ref.dtype)


def value_network_forward(state, params, *, tile_b=512):
    """state: (B, num_inputs), f32 or bf16.  params: dict of w1,b1,w2,b2,w3,b3.

    Returns (B, 1) f32, matching PyTorch ValueNetwork.forward semantics.
    """
    w1, b1, w2, b2, w3, b3 = (
        params["w1"], params["b1"], params["w2"],
        params["b2"], params["w3"], params["b3"],
    )
    B, num_inputs = state.shape
    hidden = w1.shape[1]

    # Validate/round the requested tile and pad the batch only to the 128-lane
    # granule (not to TILE_B); pick TILE_B so it divides the padded batch.
    tile_b = max(128, _round_up(int(tile_b), 128))
    B_pad = _round_up(B, 128)
    TILE_B = _pick_tile_b(B_pad, tile_b)
    n_tiles = B_pad // TILE_B
    if B_pad != B:
        state = jnp.pad(state, ((0, B_pad - B), (0, 0)))

    x_item = jnp.dtype(state.dtype).itemsize
    w_item = jnp.dtype(w1.dtype).itemsize

    # ---- VMEM budget: 2x (pipelined) state/output tiles + 1x resident weights
    #      + f32 intermediates; derive the limit instead of hard-coding 32 MiB.
    state_tile = TILE_B * num_inputs * x_item
    out_tile = TILE_B * 4
    weights = (num_inputs * hidden + hidden * hidden + hidden) * w_item
    biases = 2 * hidden * 4
    interm = 2 * TILE_B * hidden * 4
    est = 2 * (state_tile + out_tile) + weights + biases + interm
    vmem_limit = int(min(max(2 * est, 32 * 1024 * 1024), 96 * 1024 * 1024))

    flops = 2 * B_pad * (num_inputs * hidden + hidden * hidden + hidden)
    bytes_accessed = (B_pad * num_inputs * x_item + B_pad * 4
                      + weights + biases + 4)

    resident = lambda i: (0, 0)  # weights/biases: same block every grid step

    def w_spec(shape):
        # Constant block + single buffering: fetched once, half the residency.
        return pl.BlockSpec(shape, resident, pipeline_mode=pl.Buffered(1))

    out = pl.pallas_call(
        value_net_kernel,
        out_shape=jax.ShapeDtypeStruct((B_pad, 1), jnp.float32),
        grid=(n_tiles,),
        in_specs=[
            pl.BlockSpec((TILE_B, num_inputs), lambda i: (i, 0)),   # state tile
            w_spec((num_inputs, hidden)),                           # w1 (in, out)
            w_spec((1, hidden)),                                    # b1
            w_spec((hidden, hidden)),                               # w2 (in, out)
            w_spec((1, hidden)),                                    # b2
            w_spec((1, hidden)),                                    # w3 row
            pl.BlockSpec(memory_space=pltpu.MemorySpace.SMEM),      # b3 scalar
        ],
        out_specs=pl.BlockSpec((TILE_B, 1), lambda i: (i, 0)),
        compiler_params=pltpu.CompilerParams(
            dimension_semantics=("parallel",),    # v7x: shard tiles over 2 TCs
            vmem_limit_bytes=vmem_limit,
        ),
        cost_estimate=pl.CostEstimate(
            flops=flops, transcendentals=0, bytes_accessed=bytes_accessed),
    )(state, w1, b1, w2, b2, w3, b3)

    return out[:B]


def init_params(key, num_inputs, hidden_size, dtype=jnp.float32):
    """Synthetic init mimicking nn.Linear's U(-1/sqrt(fan_in), +1/sqrt(fan_in)).

    w1/w2 are stored pre-transposed as (in, out) (== PyTorch weight.T); w3 is
    the PyTorch (1, hidden) row; b1/b2 are 2-D rows (f32); b3 is a scalar (1,).
    Pass dtype=jnp.bfloat16 for bf16 MXU weights on v5e/v6e/v7x (f32 accum);
    biases always stay f32.
    """
    ks = jax.random.split(key, 6)

    def uniform(k, shape, fan_in):
        bound = 1.0 / jnp.sqrt(jnp.float32(fan_in))
        return jax.random.uniform(k, shape, jnp.float32, -bound, bound)

    return {
        "w1": uniform(ks[0], (num_inputs, hidden_size), num_inputs).astype(dtype),
        "b1": uniform(ks[1], (1, hidden_size), num_inputs),
        "w2": uniform(ks[2], (hidden_size, hidden_size), hidden_size).astype(dtype),
        "b2": uniform(ks[3], (1, hidden_size), hidden_size),
        "w3": uniform(ks[4], (1, hidden_size), hidden_size).astype(dtype),
        "b3": uniform(ks[5], (1,), hidden_size),
    }


def _reference(state, params):
    h1 = jnp.maximum(state @ params["w1"] + params["b1"], 0.0)
    h2 = jnp.maximum(h1 @ params["w2"] + params["b2"], 0.0)
    return h2 @ params["w3"].T + params["b3"]


if __name__ == "__main__":
    key = jax.random.PRNGKey(0)
    k_state, k_state2, k_params = jax.random.split(key, 3)

    # Small demo shapes consistent with the module.
    batch, num_inputs, hidden_size = 8, 16, 32
    params = init_params(k_params, num_inputs, hidden_size)  # f32 -> exact check

    state = jax.random.normal(k_state, (batch, num_inputs), jnp.float32)
    out = jax.block_until_ready(value_network_forward(state, params))
    assert out.shape == (batch, 1)
    assert jnp.allclose(out, _reference(state, params), atol=1e-5, rtol=1e-5)

    # Second check: awkward batch + non-128 tile_b exercises the rounding,
    # reduced padding and multi-tile ("parallel") grid path.
    batch2 = 300
    state2 = jax.random.normal(k_state2, (batch2, num_inputs), jnp.float32)
    out2 = jax.block_until_ready(
        value_network_forward(state2, params, tile_b=500))
    assert out2.shape == (batch2, 1)
    assert jnp.allclose(out2, _reference(state2, params), atol=1e-5, rtol=1e-5)

    print("KERNEL_OK")
</pallas_src>

<mosaic_0001>
module attributes {stable_mosaic.version = 11 : i64} {
  func.func @value_net_kernel(%arg0: i32, %arg1: memref<128x16xf32, #tpu.memory_space<vmem>>, %arg2: memref<16x32xf32, #tpu.memory_space<vmem>>, %arg3: memref<1x32xf32, #tpu.memory_space<vmem>>, %arg4: memref<32x32xf32, #tpu.memory_space<vmem>>, %arg5: memref<1x32xf32, #tpu.memory_space<vmem>>, %arg6: memref<1x32xf32, #tpu.memory_space<vmem>>, %arg7: memref<1xf32, #tpu.memory_space<smem>>, %arg8: memref<128x1xf32, #tpu.memory_space<vmem>>) attributes {dimension_semantics = [#tpu.dimension_semantics<parallel>], iteration_bounds = array<i64: 1>, scalar_prefetch = 0 : i64, scratch_operands = 0 : i64, tpu.core_type = #tpu.core_type<tc>, window_params = [{transform_indices = @transform_0, window_bounds = array<i64: 128, 16>}, {pipeline_mode = #tpu.pipeline_mode<synchronous>, transform_indices = @transform_1, window_bounds = array<i64: 16, 32>}, {pipeline_mode = #tpu.pipeline_mode<synchronous>, transform_indices = @transform_2, window_bounds = array<i64: 1, 32>}, {pipeline_mode = #tpu.pipeline_mode<synchronous>, transform_indices = @transform_3, window_bounds = array<i64: 32, 32>}, {pipeline_mode = #tpu.pipeline_mode<synchronous>, transform_indices = @transform_4, window_bounds = array<i64: 1, 32>}, {pipeline_mode = #tpu.pipeline_mode<synchronous>, transform_indices = @transform_5, window_bounds = array<i64: 1, 32>}, {transform_indices = @transform_6, window_bounds = array<i64: 1>}, {transform_indices = @transform_7, window_bounds = array<i64: 128, 1>}]} {
    %c0 = arith.constant 0 : index
    %c0_0 = arith.constant 0 : index
    %0 = vector.load %arg1[%c0, %c0_0] : memref<128x16xf32, #tpu.memory_space<vmem>>, vector<128x16xf32>
    %c0_1 = arith.constant 0 : index
    %c0_2 = arith.constant 0 : index
    %1 = vector.load %arg2[%c0_1, %c0_2] : memref<16x32xf32, #tpu.memory_space<vmem>>, vector<16x32xf32>
    %cst = arith.constant dense<0.000000e+00> : vector<128x32xf32>
    %2 = tpu.matmul %0, %1, %cst {dimension_numbers = #tpu.dot_dimension_numbers<[1], [0], [0], [1], [0, 0, 1, 1], [], []>} : vector<128x16xf32>, vector<16x32xf32>, vector<128x32xf32> -> vector<128x32xf32>
    %c0_3 = arith.constant 0 : index
    %c0_4 = arith.constant 0 : index
    %3 = vector.load %arg3[%c0_3, %c0_4] : memref<1x32xf32, #tpu.memory_space<vmem>>, vector<1x32xf32>
    %4 = vector.broadcast %3 : vector<1x32xf32> to vector<128x32xf32>
    %5 = arith.addf %2, %4 : vector<128x32xf32>
    %cst_5 = arith.constant 0.000000e+00 : f32
    %6 = vector.broadcast %cst_5 : f32 to vector<128x32xf32>
    %7 = arith.maximumf %5, %6 : vector<128x32xf32>
    %c0_6 = arith.constant 0 : index
    %c0_7 = arith.constant 0 : index
    %8 = vector.load %arg4[%c0_6, %c0_7] : memref<32x32xf32, #tpu.memory_space<vmem>>, vector<32x32xf32>
    %cst_8 = arith.constant dense<0.000000e+00> : vector<128x32xf32>
    %9 = tpu.matmul %7, %8, %cst_8 {dimension_numbers = #tpu.dot_dimension_numbers<[1], [0], [0], [1], [0, 0, 1, 1], [], []>} : vector<128x32xf32>, vector<32x32xf32>, vector<128x32xf32> -> vector<128x32xf32>
    %c0_9 = arith.constant 0 : index
    %c0_10 = arith.constant 0 : index
    %10 = vector.load %arg5[%c0_9, %c0_10] : memref<1x32xf32, #tpu.memory_space<vmem>>, vector<1x32xf32>
    %11 = vector.broadcast %10 : vector<1x32xf32> to vector<128x32xf32>
    %12 = arith.addf %9, %11 : vector<128x32xf32>
    %cst_11 = arith.constant 0.000000e+00 : f32
    %13 = vector.broadcast %cst_11 : f32 to vector<128x32xf32>
    %14 = arith.maximumf %12, %13 : vector<128x32xf32>
    %c0_12 = arith.constant 0 : index
    %c0_13 = arith.constant 0 : index
    %15 = vector.load %arg6[%c0_12, %c0_13] : memref<1x32xf32, #tpu.memory_space<vmem>>, vector<1x32xf32>
    %16 = vector.broadcast %15 : vector<1x32xf32> to vector<128x32xf32>
    %17 = arith.mulf %14, %16 : vector<128x32xf32>
    %cst_14 = arith.constant dense<0.000000e+00> : vector<128xf32>
    %18 = vector.multi_reduction <add>, %17, %cst_14 [1] : vector<128x32xf32> to vector<128xf32>
    %19 = vector.shape_cast %18 : vector<128xf32> to vector<128x1xf32>
    %c0_15 = arith.constant 0 : index
    %20 = memref.load %arg7[%c0_15] : memref<1xf32, #tpu.memory_space<smem>>
    %21 = vector.broadcast %20 : f32 to vector<128x1xf32>
    %22 = arith.addf %19, %21 : vector<128x1xf32>
    %c0_16 = arith.constant 0 : index
    %c0_17 = arith.constant 0 : index
    %23 = vector.load %arg8[%c0_16, %c0_17] : memref<128x1xf32, #tpu.memory_space<vmem>>, vector<128x1xf32>
    tpu.vector_store %arg8[%c0_16, %c0_17], %22 {strides = array<i32>} : memref<128x1xf32, #tpu.memory_space<vmem>>, vector<128x1xf32>,
    return
  }
  func.func @transform_0(%arg0: i32) -> (i32, i32) {
    %c0_i32 = arith.constant 0 : i32
    %c0_i32_0 = arith.constant 0 : i32
    return %arg0, %c0_i32 : i32, i32
  }
  func.func @transform_1(%arg0: i32) -> (i32, i32) {
    %c0_i32 = arith.constant 0 : i32
    %c0_i32_0 = arith.constant 0 : i32
    %c0_i32_1 = arith.constant 0 : i32
    return %c0_i32, %c0_i32_0 : i32, i32
  }
  func.func @transform_2(%arg0: i32) -> (i32, i32) {
    %c0_i32 = arith.constant 0 : i32
    %c0_i32_0 = arith.constant 0 : i32
    %c0_i32_1 = arith.constant 0 : i32
    return %c0_i32, %c0_i32_0 : i32, i32
  }
  func.func @transform_3(%arg0: i32) -> (i32, i32) {
    %c0_i32 = arith.constant 0 : i32
    %c0_i32_0 = arith.constant 0 : i32
    %c0_i32_1 = arith.constant 0 : i32
    return %c0_i32, %c0_i32_0 : i32, i32
  }
  func.func @transform_4(%arg0: i32) -> (i32, i32) {
    %c0_i32 = arith.constant 0 : i32
    %c0_i32_0 = arith.constant 0 : i32
    %c0_i32_1 = arith.constant 0 : i32
    return %c0_i32, %c0_i32_0 : i32, i32
  }
  func.func @transform_5(%arg0: i32) -> (i32, i32) {
    %c0_i32 = arith.constant 0 : i32
    %c0_i32_0 = arith.constant 0 : i32
    %c0_i32_1 = arith.constant 0 : i32
    return %c0_i32, %c0_i32_0 : i32, i32
  }
  func.func @transform_6(%arg0: i32) -> i32 {
    %c0_i32 = arith.constant 0 : i32
    %c0_i32_0 = arith.constant 0 : i32
    return %c0_i32 : i32
  }
  func.func @transform_7(%arg0: i32) -> (i32, i32) {
    %c0_i32 = arith.constant 0 : i32
    %c0_i32_0 = arith.constant 0 : i32
    return %arg0, %c0_i32 : i32, i32
  }
}

</mosaic_0001>

<bundles_post_ra>
// kernel: tpu_custom_call.1
= control target key start
LH: loop header
LB: loop body
LE: loop exit
PB: predicated region body
PF: predicated region fallthrough
CT: control target
= control target key end

     0   :  { %vm52_vm0 = vcmask 130048   ;;  %vm273_vm1 = vcmask 261120   ;;  %vm572_vm2 = vcmask 7168   ;;  %s1004_s1 = inlined_call_operand.vmem [shape: f32[16,32], index: 1, kind: input, shape index: {}]   ;;  %s1005_s0 = inlined_call_operand.vmem [shape: f32[128,16], index: 0, kind: input, shape index: {}]   ;;  %s1006_s3 = inlined_call_operand.vmem [shape: f32[32,32], index: 3, kind: input, shape index: {}]   ;;  %s1007_s2 = inlined_call_operand.vmem [shape: f32[1,32], index: 2, kind: input, shape index: {}]   ;;  %s1008_s4 = inlined_call_operand.vmem [shape: f32[1,32], index: 4, kind: input, shape index: {}]   ;;  %s1009_s5 = inlined_call_operand.vmem [shape: f32[1,32], index: 5, kind: input, shape index: {}]   ;;  %s1010_s6 = inlined_call_operand.<no memory space> [shape: f32[1], index: 6, kind: input, shape index: {}]   ;;  %s1011_s7 = inlined_call_operand.vmem [shape: f32[128,1], index: 7, kind: output, shape index: {}]  }
   0x1   :  { %v43_v0 = vld [vmem:[%s1004_s1] sm:$0xff]  ;;  %v44_v1 = vld [vmem:[%s1004_s1 + $0x8] sm:$0xff]  ;;  %v29_v5 = vld [vmem:[%s1005_s0 + $0x10] sm:$0xff] }
   0x2   :  { %v27_v2 = vld [vmem:[%s1005_s0] sm:$0xff]  ;;  %v726_v3 = vpack.c.bf16 %v44_v1, %v43_v0  ;;  %v28_v4 = vld [vmem:[%s1005_s0 + $0x8] sm:$0xff]  ;;  %v30_v9 = vld [vmem:[%s1005_s0 + $0x18] sm:$0xff] }
   0x3   :  { %670 = vmatprep.mubr.msk.f32.mxu0 %vm52_vm0, %v27_v2  ;;  %v262_v6 = vld [vmem:[%s1006_s3] sm:$0xff]  ;;  %v263_v7 = vld [vmem:[%s1006_s3 + $0x8] sm:$0xff]  ;;  %v33_v12 = vld [vmem:[%s1005_s0 + $0x30] sm:$0xff] }
   0x4   :  { %727 = vmatprep.subr.bf16.mxu0 %v726_v3  ;;  %v730_v8 = vpack.c.bf16 %v263_v7, %v262_v6  ;;  %v31_v10 = vld [vmem:[%s1005_s0 + $0x20] sm:$0xff]  ;;  %v32_v11 = vld [vmem:[%s1005_s0 + $0x28] sm:$0xff]  ;;  %v34_v13 = vld [vmem:[%s1005_s0 + $0x38] sm:$0xff] }
   0x5   :  { %729 = vmatpush3.bf16.msra.mxu0 %v726_v3  ;;  %v35_v14 = vld [vmem:[%s1005_s0 + $0x40] sm:$0xff]  ;;  %v36_v15 = vld [vmem:[%s1005_s0 + $0x48] sm:$0xff]  ;;  %v37_v16 = vld [vmem:[%s1005_s0 + $0x50] sm:$0xff] }
   0x6   :  { %731 = vmatprep.subr.bf16.mxu1 %v730_v8  ;;  %v38_v17 = vld [vmem:[%s1005_s0 + $0x58] sm:$0xff]  ;;  %v39_v18 = vld [vmem:[%s1005_s0 + $0x60] sm:$0xff]  ;;  %v40_v19 = vld [vmem:[%s1005_s0 + $0x68] sm:$0xff] }
   0x7   :  { %733 = vmatpush3.bf16.msra.mxu1 %v730_v8  ;;  %v41_v20 = vld [vmem:[%s1005_s0 + $0x70] sm:$0xff]  ;;  %v42_v21 = vld [vmem:[%s1005_s0 + $0x78] sm:$0xff]  ;;  %v593_v25 = vld [vmem:[%s1007_s2] ss:$0 sm:$0xff] }
   0x8   :  { %671 = vmatmul.mubr.msk.f32.vlgmr.msra.gmra.mrb[0].mxu0 %vm52_vm0, %v28_v4  ;;  %v264_v22 = vld [vmem:[%s1006_s3 + $0x10] sm:$0xff]  ;;  %v265_v23 = vld [vmem:[%s1006_s3 + $0x18] sm:$0xff] }
   0x9   :  { %673 = vmatprep.mubr.msk.f32.mxu0 %vm52_vm0, %v29_v5  ;;  %v734_v24 = vpack.c.bf16 %v265_v23, %v264_v22 }
   0xb   :  { %735 = vmatprep.subr.bf16.mxu1 %v734_v24 }
   0xc   :  { %674 = vmatmul.mubr.msk.f32.gmra.mrb[2].mxu0 %vm52_vm0, %v30_v9  ;;  %737 = vmatpush3.bf16.msra.mxu1 %v734_v24 }
   0xd   :  { %676 = vmatprep.mubr.msk.f32.mxu0 %vm52_vm0, %v31_v10  ;;  %v882_v10 = vld [vmem:[%s1008_s4] ss:$0 sm:$0xff] }
  0x10   :  { %677 = vmatmul.mubr.msk.f32.gmra.mrb[4].mxu0 %vm52_vm0, %v32_v11 }
  0x11   :  { %679 = vmatprep.mubr.msk.f32.mxu0 %vm52_vm0, %v33_v12 }
  0x14   :  { %680 = vmatmul.mubr.msk.f32.gmra.mrb[6].mxu0 %vm52_vm0, %v34_v13 }
  0x15   :  { %682 = vmatprep.mubr.msk.f32.mxu0 %vm52_vm0, %v35_v14 }
  0x18   :  { %683 = vmatmul.mubr.msk.f32.gmra.mrb[8].mxu0 %vm52_vm0, %v36_v15  ;;  %v889_v15 = vld [vmem:[%s1009_s5] ss:$0 sm:$0xff] }
  0x19   :  { %685 = vmatprep.mubr.msk.f32.mxu0 %vm52_vm0, %v37_v16 }
  0x1c   :  { %686 = vmatmul.mubr.msk.f32.gmra.mrb[10].mxu0 %vm52_vm0, %v38_v17 }
  0x1d   :  { %688 = vmatprep.mubr.msk.f32.mxu0 %vm52_vm0, %v39_v18 }
  0x20   :  { %689 = vmatmul.mubr.msk.f32.gmra.mrb[12].mxu0 %vm52_vm0, %v40_v19 }
  0x21   :  { %691 = vmatprep.mubr.msk.f32.mxu0 %vm52_vm0, %v41_v20 }
  0x24   :  { %692 = vmatmul.mubr.msk.f32.gmra.mrb[14].mxu0 %vm52_vm0, %v42_v21 }
  0xdb   :  { %v672_v26 = vpop.f32.mrb[0].mxu0 }
  0xdc   :  { %v173_v27 = vadd.f32 %v672_v26, %v593_v25  ;;  %v167_v28 = vpop.f32.mrb[1].mxu0 }
  0xdd   :  { %v168_v29 = vadd.f32 %v593_v25, %v167_v28 }
  0xde   :  { %v247_v32 = vmax.f32 %v173_v27, 0.0 }
  0xdf   :  { %v246_v30 = vmax.f32 %v168_v29, 0.0  ;;  %v675_v31 = vpop.f32.mrb[2].mxu0 }
  0xe0   :  { %v183_v33 = vadd.f32 %v675_v31, %v593_v25  ;;  %v177_v34 = vpop.f32.mrb[3].mxu0 }
  0xe1   :  { %v178_v35 = vadd.f32 %v593_v25, %v177_v34  ;;  %702 = vmatprep.mubr.msk.f32.mxu1 %vm273_vm1, %v246_v30 }
  0xe2   :  { %703 = vmatmul.mubr.msk.f32.vlgmr.msra.gmra.mrb[0].mxu1 %vm273_vm1, %v247_v32  ;;  %v249_v38 = vmax.f32 %v183_v33, 0.0 }
  0xe3   :  { %v248_v36 = vmax.f32 %v178_v35, 0.0  ;;  %v678_v37 = vpop.f32.mrb[4].mxu0 }
  0xe4   :  { %v193_v39 = vadd.f32 %v678_v37, %v593_v25  ;;  %v187_v40 = vpop.f32.mrb[5].mxu0 }
  0xe5   :  { %v188_v41 = vadd.f32 %v593_v25, %v187_v40  ;;  %705 = vmatprep.mubr.msk.f32.mxu1 %vm273_vm1, %v248_v36 }
  0xe6   :  { %v251_v42 = vmax.f32 %v193_v39, 0.0  ;;  %706 = vmatmul.mubr.msk.f32.gmra.mrb[2].mxu1 %vm273_vm1, %v249_v38 }
  0xe7   :  { %v250_v43 = vmax.f32 %v188_v41, 0.0  ;;  %v681_v44 = vpop.f32.mrb[6].mxu0 }
  0xe8   :  { %v203_v45 = vadd.f32 %v681_v44, %v593_v25  ;;  %v197_v46 = vpop.f32.mrb[7].mxu0 }
  0xe9   :  { %v198_v47 = vadd.f32 %v593_v25, %v197_v46  ;;  %708 = vmatprep.mubr.msk.f32.mxu1 %vm273_vm1, %v250_v43 }
  0xea   :  { %v253_v48 = vmax.f32 %v203_v45, 0.0  ;;  %709 = vmatmul.mubr.msk.f32.gmra.mrb[4].mxu1 %vm273_vm1, %v251_v42 }
  0xeb   :  { %v252_v49 = vmax.f32 %v198_v47, 0.0  ;;  %v684_v50 = vpop.f32.mrb[8].mxu0 }
  0xec   :  { %v213_v51 = vadd.f32 %v684_v50, %v593_v25  ;;  %v207_v52 = vpop.f32.mrb[9].mxu0 }
  0xed   :  { %v208_v53 = vadd.f32 %v593_v25, %v207_v52  ;;  %711 = vmatprep.mubr.msk.f32.mxu1 %vm273_vm1, %v252_v49 }
  0xee   :  { %v255_v54 = vmax.f32 %v213_v51, 0.0  ;;  %712 = vmatmul.mubr.msk.f32.gmra.mrb[6].mxu1 %vm273_vm1, %v253_v48 }
  0xef   :  { %v254_v55 = vmax.f32 %v208_v53, 0.0  ;;  %v687_v56 = vpop.f32.mrb[10].mxu0 }
  0xf0   :  { %v223_v57 = vadd.f32 %v687_v56, %v593_v25  ;;  %v217_v58 = vpop.f32.mrb[11].mxu0 }
  0xf1   :  { %v218_v59 = vadd.f32 %v593_v25, %v217_v58  ;;  %714 = vmatprep.mubr.msk.f32.mxu1 %vm273_vm1, %v254_v55 }
  0xf2   :  { %v257_v60 = vmax.f32 %v223_v57, 0.0  ;;  %715 = vmatmul.mubr.msk.f32.gmra.mrb[8].mxu1 %vm273_vm1, %v255_v54 }
  0xf3   :  { %v256_v61 = vmax.f32 %v218_v59, 0.0  ;;  %v690_v62 = vpop.f32.mrb[12].mxu0 }
  0xf4   :  { %v233_v63 = vadd.f32 %v690_v62, %v593_v25  ;;  %v227_v0 = vpop.f32.mrb[13].mxu0 }
  0xf5   :  { %v228_v1 = vadd.f32 %v593_v25, %v227_v0  ;;  %717 = vmatprep.mubr.msk.f32.mxu1 %vm273_vm1, %v256_v61 }
  0xf6   :  { %v259_v2 = vmax.f32 %v233_v63, 0.0  ;;  %718 = vmatmul.mubr.msk.f32.gmra.mrb[10].mxu1 %vm273_vm1, %v257_v60 }
  0xf7   :  { %v258_v3 = vmax.f32 %v228_v1, 0.0  ;;  %v693_v4 = vpop.f32.mrb[14].mxu0 }
  0xf8   :  { %v243_v5 = vadd.f32 %v693_v4, %v593_v25  ;;  %v237_v6 = vpop.f32.mrb[15].mxu0 }
  0xf9   :  { %v238_v7 = vadd.f32 %v593_v25, %v237_v6  ;;  %720 = vmatprep.mubr.msk.f32.mxu1 %vm273_vm1, %v258_v3 }
  0xfa   :  { %v261_v8 = vmax.f32 %v243_v5, 0.0  ;;  %721 = vmatmul.mubr.msk.f32.gmra.mrb[12].mxu1 %vm273_vm1, %v259_v2 }
  0xfb   :  { %v260_v9 = vmax.f32 %v238_v7, 0.0 }
  0xfd   :  { %723 = vmatprep.mubr.msk.f32.mxu1 %vm273_vm1, %v260_v9 }
  0xfe   :  { %724 = vmatmul.mubr.msk.f32.gmra.mrb[14].mxu1 %vm273_vm1, %v261_v8 }
 0x1b5   :  { %v704_v11 = vpop.f32.mrb[0].mxu1 }
 0x1b6   :  { %v394_v12 = vadd.f32 %v704_v11, %v882_v10  ;;  %v388_v13 = vpop.f32.mrb[1].mxu1 }
 0x1b7   :  { %v389_v14 = vadd.f32 %v882_v10, %v388_v13 }
 0x1b8   :  { %v468_v16 = vmax.f32 %v394_v12, 0.0 }
 0x1b9   :  { %v467_v17 = vmax.f32 %v389_v14, 0.0  ;;  %v707_v18 = vpop.f32.mrb[2].mxu1 }
 0x1ba   :  { %v404_v19 = vadd.f32 %v707_v18, %v882_v10  ;;  %v398_v20 = vpop.f32.mrb[3].mxu1  ;;  %v491_v21 = vmul.f32 %v889_v15, %v468_v16 }
 0x1bb   :  { %v399_v22 = vadd.f32 %v882_v10, %v398_v20  ;;  %v490_v25 = vmul.f32 %v889_v15, %v467_v17 }
 0x1bc   :  { %v470_v23 = vmax.f32 %v404_v19, 0.0  ;;  %v509_v24 = vsel %vm273_vm1, %v491_v21, 0.0 }
 0x1bd   :  { %v469_v26 = vmax.f32 %v399_v22, 0.0  ;;  %510 = vadd.xlane.f32.xlu0 %v509_v24  ;;  %v710_v27 = vpop.f32.mrb[4].mxu1  ;;  %v506_v34 = vsel %vm273_vm1, %v490_v25, 0.0 }
 0x1be   :  { %v414_v28 = vadd.f32 %v710_v27, %v882_v10  ;;  %v408_v29 = vpop.f32.mrb[5].mxu1  ;;  %v493_v30 = vmul.f32 %v889_v15, %v470_v23 }
 0x1bf   :  { %v409_v31 = vadd.f32 %v882_v10, %v408_v29  ;;  %v492_v35 = vmul.f32 %v889_v15, %v469_v26  ;;  %v555_v29 = vstv %s1010_s6 }
 0x1c0   :  { %v472_v32 = vmax.f32 %v414_v28, 0.0  ;;  %v515_v33 = vsel %vm273_vm1, %v493_v30, 0.0 }
 0x1c1   :  { %v471_v36 = vmax.f32 %v409_v31, 0.0  ;;  %516 = vadd.xlane.f32.xlu1 %v515_v33  ;;  %v713_v37 = vpop.f32.mrb[6].mxu1  ;;  %507 = vadd.xlane.f32.xlu0 %v506_v34  ;;  %v512_v43 = vsel %vm273_vm1, %v492_v35, 0.0 }
 0x1c2   :  { %v424_v38 = vadd.f32 %v713_v37, %v882_v10  ;;  %v418_v39 = vpop.f32.mrb[7].mxu1  ;;  %v495_v44 = vmul.f32 %v889_v15, %v472_v32 }
 0x1c3   :  { %v419_v40 = vadd.f32 %v882_v10, %v418_v39  ;;  %v494_v41 = vmul.f32 %v889_v15, %v471_v36 }
 0x1c4   :  { %v474_v42 = vmax.f32 %v424_v38, 0.0  ;;  %v521_v53 = vsel %vm273_vm1, %v495_v44, 0.0 }
 0x1c5   :  { %v473_v45 = vmax.f32 %v419_v40, 0.0  ;;  %v716_v46 = vpop.f32.mrb[8].mxu1  ;;  %513 = vadd.xlane.f32.xlu1 %v512_v43  ;;  %v518_v47 = vsel %vm273_vm1, %v494_v41, 0.0 }
 0x1c6   :  { %v434_v48 = vadd.f32 %v716_v46, %v882_v10  ;;  %v428_v49 = vpop.f32.mrb[9].mxu1  ;;  %519 = vadd.xlane.f32.xlu0 %v518_v47  ;;  %v497_v54 = vmul.f32 %v889_v15, %v474_v42 }
 0x1c7   :  { %v429_v50 = vadd.f32 %v882_v10, %v428_v49  ;;  %v496_v51 = vmul.f32 %v889_v15, %v473_v45 }
 0x1c8   :  { %v476_v52 = vmax.f32 %v434_v48, 0.0  ;;  %v527_v63 = vsel %vm273_vm1, %v497_v54, 0.0 }
 0x1c9   :  { %v475_v55 = vmax.f32 %v429_v50, 0.0  ;;  %v719_v56 = vpop.f32.mrb[10].mxu1  ;;  %522 = vadd.xlane.f32.xlu1 %v521_v53  ;;  %v524_v57 = vsel %vm273_vm1, %v496_v51, 0.0 }
 0x1ca   :  { %v444_v58 = vadd.f32 %v719_v56, %v882_v10  ;;  %v438_v59 = vpop.f32.mrb[11].mxu1  ;;  %525 = vadd.xlane.f32.xlu0 %v524_v57  ;;  %v499_v0 = vmul.f32 %v889_v15, %v476_v52 }
 0x1cb   :  { %v439_v60 = vadd.f32 %v882_v10, %v438_v59  ;;  %v498_v61 = vmul.f32 %v889_v15, %v475_v55 }
 0x1cc   :  { %v478_v62 = vmax.f32 %v444_v58, 0.0  ;;  %v533_v9 = vsel %vm273_vm1, %v499_v0, 0.0 }
 0x1cd   :  { %v477_v1 = vmax.f32 %v439_v60, 0.0  ;;  %v722_v2 = vpop.f32.mrb[12].mxu1  ;;  %528 = vadd.xlane.f32.xlu1 %v527_v63  ;;  %v530_v3 = vsel %vm273_vm1, %v498_v61, 0.0 }
 0x1ce   :  { %v454_v4 = vadd.f32 %v722_v2, %v882_v10  ;;  %v448_v5 = vpop.f32.mrb[13].mxu1  ;;  %531 = vadd.xlane.f32.xlu0 %v530_v3  ;;  %v501_v11 = vmul.f32 %v889_v15, %v478_v62 }
 0x1cf   :  { %v449_v6 = vadd.f32 %v882_v10, %v448_v5  ;;  %v500_v7 = vmul.f32 %v889_v15, %v477_v1 }
 0x1d0   :  { %v480_v8 = vmax.f32 %v454_v4, 0.0  ;;  %v539_v21 = vsel %vm273_vm1, %v501_v11, 0.0 }
 0x1d1   :  { %v479_v12 = vmax.f32 %v449_v6, 0.0  ;;  %v725_v13 = vpop.f32.mrb[14].mxu1  ;;  %534 = vadd.xlane.f32.xlu1 %v533_v9  ;;  %v536_v14 = vsel %vm273_vm1, %v500_v7, 0.0 }
 0x1d2   :  { %v464_v16 = vadd.f32 %v725_v13, %v882_v10  ;;  %v458_v17 = vpop.f32.mrb[15].mxu1  ;;  %537 = vadd.xlane.f32.xlu0 %v536_v14  ;;  %v503_v22 = vmul.f32 %v889_v15, %v480_v8 }
 0x1d3   :  { %v459_v18 = vadd.f32 %v882_v10, %v458_v17  ;;  %v502_v19 = vmul.f32 %v889_v15, %v479_v12 }
 0x1d4   :  { %v482_v20 = vmax.f32 %v464_v16, 0.0  ;;  %v545_v26 = vsel %vm273_vm1, %v503_v22, 0.0 }
 0x1d5   :  { %v481_v23 = vmax.f32 %v459_v18, 0.0  ;;  %540 = vadd.xlane.f32.xlu1 %v539_v21  ;;  %v542_v24 = vsel %vm273_vm1, %v502_v19, 0.0 }
 0x1d6   :  { %543 = vadd.xlane.f32.xlu0 %v542_v24  ;;  %v505_v27 = vmul.f32 %v889_v15, %v482_v20 }
 0x1d7   :  { %v504_v25 = vmul.f32 %v889_v15, %v481_v23 }
 0x1d8   :  { %v551_v28 = vsel %vm273_vm1, %v505_v27, 0.0 }
 0x1d9   :  { %546 = vadd.xlane.f32.xlu1 %v545_v26  ;;  %v548_v10 = vsel %vm273_vm1, %v504_v25, 0.0 }
 0x1da   :  { %549 = vadd.xlane.f32.xlu0 %v548_v10 }
 0x1dd   :  { %552 = vadd.xlane.f32.xlu1 %v551_v28 }
 0x24a   :  { %v511_v30 = vpop.xlane.xlu0 %510 }
 0x24b   :  { %v557_v31 = vadd.f32 %v555_v29, %v511_v30 }
 0x24d   :  { %574 = vst.msk [vmem:[%s1011_s7 + $0x8] sm:$0xff] %vm572_vm2, %v557_v31 }
 0x24e   :  { %v517_v15 = vpop.xlane.xlu1 %516  ;;  %v508_v32 = vpop.xlane.xlu0 %507 }
 0x24f   :  { %v559_v33 = vadd.f32 %v555_v29, %v517_v15  ;;  %v556_v34 = vadd.f32 %v555_v29, %v508_v32 }
 0x251   :  { %576 = vst.msk [vmem:[%s1011_s7 + $0x18] sm:$0xff] %vm572_vm2, %v559_v33  ;;  %573 = vst.msk [vmem:[%s1011_s7] sm:$0xff] %vm572_vm2, %v556_v34 }
 0x252   :  { %v514_v35 = vpop.xlane.xlu1 %513 }
 0x253   :  { %v558_v36 = vadd.f32 %v555_v29, %v514_v35  ;;  %v520_v37 = vpop.xlane.xlu0 %519 }
 0x254   :  { %v560_v38 = vadd.f32 %v555_v29, %v520_v37 }
 0x255   :  { %575 = vst.msk [vmem:[%s1011_s7 + $0x10] sm:$0xff] %vm572_vm2, %v558_v36 }
 0x256   :  { %577 = vst.msk [vmem:[%s1011_s7 + $0x20] sm:$0xff] %vm572_vm2, %v560_v38  ;;  %v523_v39 = vpop.xlane.xlu1 %522 }
 0x257   :  { %v561_v40 = vadd.f32 %v555_v29, %v523_v39  ;;  %v526_v41 = vpop.xlane.xlu0 %525 }
 0x258   :  { %v562_v42 = vadd.f32 %v555_v29, %v526_v41 }
 0x259   :  { %578 = vst.msk [vmem:[%s1011_s7 + $0x28] sm:$0xff] %vm572_vm2, %v561_v40 }
 0x25a   :  { %579 = vst.msk [vmem:[%s1011_s7 + $0x30] sm:$0xff] %vm572_vm2, %v562_v42  ;;  %v529_v43 = vpop.xlane.xlu1 %528 }
 0x25b   :  { %v563_v44 = vadd.f32 %v555_v29, %v529_v43  ;;  %v532_v45 = vpop.xlane.xlu0 %531 }
 0x25c   :  { %v564_v46 = vadd.f32 %v555_v29, %v532_v45 }
 0x25d   :  { %580 = vst.msk [vmem:[%s1011_s7 + $0x38] sm:$0xff] %vm572_vm2, %v563_v44 }
 0x25e   :  { %581 = vst.msk [vmem:[%s1011_s7 + $0x40] sm:$0xff] %vm572_vm2, %v564_v46  ;;  %v535_v47 = vpop.xlane.xlu1 %534 }
 0x25f   :  { %v565_v48 = vadd.f32 %v555_v29, %v535_v47  ;;  %v538_v49 = vpop.xlane.xlu0 %537 }
 0x260   :  { %v566_v50 = vadd.f32 %v555_v29, %v538_v49 }
 0x261   :  { %582 = vst.msk [vmem:[%s1011_s7 + $0x48] sm:$0xff] %vm572_vm2, %v565_v48 }
 0x262   :  { %583 = vst.msk [vmem:[%s1011_s7 + $0x50] sm:$0xff] %vm572_vm2, %v566_v50  ;;  %v541_v51 = vpop.xlane.xlu1 %540 }
 0x263   :  { %v567_v52 = vadd.f32 %v555_v29, %v541_v51  ;;  %v544_v53 = vpop.xlane.xlu0 %543 }
 0x264   :  { %v568_v54 = vadd.f32 %v555_v29, %v544_v53 }
 0x265   :  { %584 = vst.msk [vmem:[%s1011_s7 + $0x58] sm:$0xff] %vm572_vm2, %v567_v52 }
 0x266   :  { %585 = vst.msk [vmem:[%s1011_s7 + $0x60] sm:$0xff] %vm572_vm2, %v568_v54  ;;  %v547_v55 = vpop.xlane.xlu1 %546 }
 0x267   :  { %v569_v56 = vadd.f32 %v555_v29, %v547_v55  ;;  %v550_v57 = vpop.xlane.xlu0 %549 }
 0x268   :  { %v570_v58 = vadd.f32 %v555_v29, %v550_v57 }
 0x269   :  { %586 = vst.msk [vmem:[%s1011_s7 + $0x68] sm:$0xff] %vm572_vm2, %v569_v56 }
 0x26a   :  { %587 = vst.msk [vmem:[%s1011_s7 + $0x70] sm:$0xff] %vm572_vm2, %v570_v58  ;;  %v553_v59 = vpop.xlane.xlu1 %552 }
 0x26b   :  { %v571_v60 = vadd.f32 %v555_v29, %v553_v59 }
 0x26d   :  { %588 = vst.msk [vmem:[%s1011_s7 + $0x78] sm:$0xff] %vm572_vm2, %v571_v60 }

</bundles_post_ra>
